<compile_context>
chip_gen: v7x
topology: tpu7x:2x2x1
jax: 0.10.0
libtpu: 0.0.40
codegen_flags: <defaults>
</compile_context>

<pallas_src>
import jax
import jax.numpy as jnp
from jax.experimental import pallas as pl
from jax.experimental.pallas import tpu as pltpu

IN_DIM = 8      # LSTM input_size
H_RNN = 32      # LSTM hidden_size
H_FC = 16       # fc1 output dim


def decoder_rnn_pv_kernel(x_ref, len_ref, wih_ref, whh_ref, b_ref,
                          w1_ref, b1_ref, w2_ref, b2_ref, out_ref):
    # x_ref   : (T*B, IN_DIM) f32  time-major, flattened (row = t*B + b)
    # len_ref : (B, 1)        i32
    # wih_ref : (IN_DIM, 4H)  f32  (= W_ih.T)
    # whh_ref : (H, 4H)       f32  (= W_hh.T)
    # b_ref   : (1, 4H)       f32  (= b_ih + b_hh)
    # w1_ref  : (H, H_FC), b1_ref: (1, H_FC)
    # w2_ref  : (1, H_FC)  (fc2 weight as a row -> VPU reduce)
    # b2_ref  : (1, 1)
    # out_ref : (B, 1)        f32
    B = out_ref.shape[0]
    T = x_ref.shape[0] // B
    H = whh_ref.shape[0]

    whh = whh_ref[...]
    lens = len_ref[...]                                    # (B, 1) int32

    # ---- hoisted input projection: no sequential dependence, single matmul
    #      for all T steps, bias folded in.
    xp = (jnp.dot(x_ref[...], wih_ref[...], preferred_element_type=jnp.float32)
          + b_ref[...])                                    # (T*B, 4H)

    h = jnp.zeros((B, H), jnp.float32)
    c = jnp.zeros((B, H), jnp.float32)
    hcap = jnp.zeros((B, H), jnp.float32)

    # ---- statically unrolled recurrence: one MXU matmul + two full-width
    #      transcendentals per serial step.
    for t in range(T):
        gates = xp[t * B:(t + 1) * B, :] + jnp.dot(
            h, whh, preferred_element_type=jnp.float32)    # (B, 4H)
        sg = jax.nn.sigmoid(gates)    # full 128-lane EUP pass (i, f, o lanes)
        th = jnp.tanh(gates)          # full 128-lane EUP pass (g lanes)
        # PyTorch LSTM gate order: i, f, g, o
        i = sg[:, 0:H]
        f = sg[:, H:2 * H]
        g = th[:, 2 * H:3 * H]
        o = sg[:, 3 * H:4 * H]
        c = f * c + i * g
        h = o * jnp.tanh(c)
        # capture hidden state at the last *valid* step of each sequence
        hcap = jnp.where(lens == (t + 1), h, hcap)

    # pad_packed_sequence zero-pads: RNN_out[:, -1, :] is zero for any row
    # whose length is shorter than max(lengths).
    max_len = jnp.max(lens, axis=0, keepdims=True)         # (1, 1)
    out1 = hcap * (lens == max_len).astype(jnp.float32)    # (B, H)

    z1 = jnp.dot(out1, w1_ref[...], preferred_element_type=jnp.float32) + b1_ref[...]
    z1 = jnp.maximum(z1, 0.0)                              # ReLU (dropout p=0 -> identity)
    # fc2 (N=1) as VPU multiply + lane reduce instead of an MXU matmul.
    z2 = jnp.sum(z1 * w2_ref[...], axis=1, keepdims=True) + b2_ref[...]
    out_ref[...] = jax.nn.sigmoid(z2)


def decoder_rnn_pv(x_pv, x_lengths, params):
    """x_pv: (B, T, 8) float32, batch-first; x_lengths: (B,) int32."""
    B, T, _ = x_pv.shape
    # time-major & flattened so the kernel can do one big input projection
    x_tb = jnp.transpose(x_pv, (1, 0, 2)).reshape(T * B, IN_DIM).astype(jnp.float32)
    lens = x_lengths.astype(jnp.int32).reshape(B, 1)

    wih_t = params["w_ih"].T.astype(jnp.float32)                    # (IN, 4H)
    whh_t = params["w_hh"].T.astype(jnp.float32)                    # (H, 4H)
    bsum = (params["b_ih"] + params["b_hh"]).reshape(1, -1).astype(jnp.float32)
    w1_t = params["fc1_w"].T.astype(jnp.float32)                    # (H, H_FC)
    b1 = params["fc1_b"].reshape(1, -1).astype(jnp.float32)         # (1, H_FC)
    w2_row = params["fc2_w"].reshape(1, -1).astype(jnp.float32)     # (1, H_FC)
    b2 = params["fc2_b"].reshape(1, 1).astype(jnp.float32)          # (1, 1)

    # TODO(synk): for large B, add a batch grid (dimension_semantics=("parallel",))
    # and stream x over T; unnecessary at these toy sizes.
    vmem = pl.BlockSpec(memory_space=pltpu.MemorySpace.VMEM)
    return pl.pallas_call(
        decoder_rnn_pv_kernel,
        out_shape=jax.ShapeDtypeStruct((B, 1), jnp.float32),
        in_specs=[vmem] * 9,
        out_specs=vmem,
    )(x_tb, lens, wih_t, whh_t, bsum, w1_t, b1, w2_row, b2)


def init_params(key):
    """Deterministic synthetic parameters with PyTorch-like shapes."""
    ks = jax.random.split(key, 8)
    s = 1.0 / jnp.sqrt(H_RNN)
    return {
        "w_ih": jax.random.uniform(ks[0], (4 * H_RNN, IN_DIM), jnp.float32, -s, s),
        "w_hh": jax.random.uniform(ks[1], (4 * H_RNN, H_RNN), jnp.float32, -s, s),
        "b_ih": jax.random.uniform(ks[2], (4 * H_RNN,), jnp.float32, -s, s),
        "b_hh": jax.random.uniform(ks[3], (4 * H_RNN,), jnp.float32, -s, s),
        "fc1_w": jax.random.uniform(ks[4], (H_FC, H_RNN), jnp.float32, -s, s),
        "fc1_b": jax.random.uniform(ks[5], (H_FC,), jnp.float32, -s, s),
        "fc2_w": jax.random.uniform(ks[6], (1, H_FC), jnp.float32, -0.25, 0.25),
        "fc2_b": jax.random.uniform(ks[7], (1,), jnp.float32, -0.25, 0.25),
    }


def reference_forward(x_pv, x_lengths, params):
    """Pure-JAX reference reproducing the PyTorch forward semantics."""
    B, T, _ = x_pv.shape
    H = H_RNN
    wih, whh = params["w_ih"], params["w_hh"]
    b = params["b_ih"] + params["b_hh"]

    def cell(carry, x_t):
        h, c = carry
        gates = x_t @ wih.T + h @ whh.T + b
        i = jax.nn.sigmoid(gates[:, 0:H])
        f = jax.nn.sigmoid(gates[:, H:2 * H])
        g = jnp.tanh(gates[:, 2 * H:3 * H])
        o = jax.nn.sigmoid(gates[:, 3 * H:4 * H])
        c = f * c + i * g
        h = o * jnp.tanh(c)
        return (h, c), h

    (_, _), hs = jax.lax.scan(cell, (jnp.zeros((B, H)), jnp.zeros((B, H))),
                              jnp.transpose(x_pv, (1, 0, 2)))
    hs = jnp.transpose(hs, (1, 0, 2))                      # (B, T, H)
    last_h = jnp.take_along_axis(
        hs, (x_lengths - 1)[:, None, None].astype(jnp.int32), axis=1)[:, 0, :]
    mask = (x_lengths == jnp.max(x_lengths)).astype(jnp.float32)[:, None]
    out1 = last_h * mask
    z1 = jax.nn.relu(out1 @ params["fc1_w"].T + params["fc1_b"])
    z2 = z1 @ params["fc2_w"].T + params["fc2_b"]
    return jax.nn.sigmoid(z2)


if __name__ == "__main__":
    key = jax.random.PRNGKey(0)
    kx, kp = jax.random.split(key)

    B, T = 2, 8
    x_pv = jax.random.normal(kx, (B, T, IN_DIM), jnp.float32)
    x_lengths = jnp.array([8, 5], dtype=jnp.int32)          # varying lengths
    params = init_params(kp)

    out = decoder_rnn_pv(x_pv, x_lengths, params)
    out = jax.block_until_ready(out)

    ref = reference_forward(x_pv, x_lengths, params)
    assert out.shape == (B, 1)
    assert jnp.allclose(out, ref, atol=1e-3, rtol=1e-3), (out, ref)

    print("KERNEL_OK")
</pallas_src>

<mosaic_0001>
module attributes {stable_mosaic.version = 11 : i64} {
  func.func @decoder_rnn_pv_kernel(%arg0: memref<16x8xf32, #tpu.memory_space<vmem>>, %arg1: memref<2x1xi32, #tpu.memory_space<vmem>>, %arg2: memref<8x128xf32, #tpu.memory_space<vmem>>, %arg3: memref<32x128xf32, #tpu.memory_space<vmem>>, %arg4: memref<1x128xf32, #tpu.memory_space<vmem>>, %arg5: memref<32x16xf32, #tpu.memory_space<vmem>>, %arg6: memref<1x16xf32, #tpu.memory_space<vmem>>, %arg7: memref<1x16xf32, #tpu.memory_space<vmem>>, %arg8: memref<1x1xf32, #tpu.memory_space<vmem>>, %arg9: memref<2x1xf32, #tpu.memory_space<vmem>>) attributes {dimension_semantics = [], scalar_prefetch = 0 : i64, scratch_operands = 0 : i64, tpu.core_type = #tpu.core_type<tc>} {
    %c0 = arith.constant 0 : index
    %c0_0 = arith.constant 0 : index
    %0 = vector.load %arg3[%c0, %c0_0] : memref<32x128xf32, #tpu.memory_space<vmem>>, vector<32x128xf32>
    %c0_1 = arith.constant 0 : index
    %c0_2 = arith.constant 0 : index
    %1 = vector.load %arg1[%c0_1, %c0_2] : memref<2x1xi32, #tpu.memory_space<vmem>>, vector<2x1xi32>
    %c0_3 = arith.constant 0 : index
    %c0_4 = arith.constant 0 : index
    %2 = vector.load %arg0[%c0_3, %c0_4] : memref<16x8xf32, #tpu.memory_space<vmem>>, vector<16x8xf32>
    %c0_5 = arith.constant 0 : index
    %c0_6 = arith.constant 0 : index
    %3 = vector.load %arg2[%c0_5, %c0_6] : memref<8x128xf32, #tpu.memory_space<vmem>>, vector<8x128xf32>
    %cst = arith.constant dense<0.000000e+00> : vector<16x128xf32>
    %4 = tpu.matmul %2, %3, %cst {dimension_numbers = #tpu.dot_dimension_numbers<[1], [0], [0], [1], [0, 0, 1, 1], [], []>} : vector<16x8xf32>, vector<8x128xf32>, vector<16x128xf32> -> vector<16x128xf32>
    %c0_7 = arith.constant 0 : index
    %c0_8 = arith.constant 0 : index
    %5 = vector.load %arg4[%c0_7, %c0_8] : memref<1x128xf32, #tpu.memory_space<vmem>>, vector<1x128xf32>
    %6 = vector.broadcast %5 : vector<1x128xf32> to vector<16x128xf32>
    %7 = arith.addf %4, %6 : vector<16x128xf32>
    %cst_9 = arith.constant 0.000000e+00 : f32
    %8 = vector.broadcast %cst_9 : f32 to vector<2x32xf32>
    %cst_10 = arith.constant 0.000000e+00 : f32
    %9 = vector.broadcast %cst_10 : f32 to vector<2x32xf32>
    %cst_11 = arith.constant 0.000000e+00 : f32
    %10 = vector.broadcast %cst_11 : f32 to vector<2x32xf32>
    %11 = vector.extract_strided_slice %7 {offsets = [0, 0], sizes = [2, 128], strides = [1, 1]} : vector<16x128xf32> to vector<2x128xf32>
    %cst_12 = arith.constant dense<0.000000e+00> : vector<2x128xf32>
    %12 = tpu.matmul %8, %0, %cst_12 {dimension_numbers = #tpu.dot_dimension_numbers<[1], [0], [0], [1], [0, 0, 1, 1], [], []>} : vector<2x32xf32>, vector<32x128xf32>, vector<2x128xf32> -> vector<2x128xf32>
    %13 = arith.addf %11, %12 : vector<2x128xf32>
    %14 = arith.negf %13 : vector<2x128xf32>
    %15 = math.exp %14 : vector<2x128xf32>
    %cst_13 = arith.constant 1.000000e+00 : f32
    %16 = vector.broadcast %cst_13 : f32 to vector<2x128xf32>
    %17 = arith.addf %16, %15 : vector<2x128xf32>
    %18 = arith.divf %16, %17 : vector<2x128xf32>
    %19 = math.tanh %13 : vector<2x128xf32>
    %20 = vector.extract_strided_slice %18 {offsets = [0, 0], sizes = [2, 32], strides = [1, 1]} : vector<2x128xf32> to vector<2x32xf32>
    %21 = vector.extract_strided_slice %18 {offsets = [0, 32], sizes = [2, 32], strides = [1, 1]} : vector<2x128xf32> to vector<2x32xf32>
    %22 = vector.extract_strided_slice %19 {offsets = [0, 64], sizes = [2, 32], strides = [1, 1]} : vector<2x128xf32> to vector<2x32xf32>
    %23 = vector.extract_strided_slice %18 {offsets = [0, 96], sizes = [2, 32], strides = [1, 1]} : vector<2x128xf32> to vector<2x32xf32>
    %24 = arith.mulf %21, %9 : vector<2x32xf32>
    %25 = arith.mulf %20, %22 : vector<2x32xf32>
    %26 = arith.addf %24, %25 : vector<2x32xf32>
    %27 = math.tanh %26 : vector<2x32xf32>
    %28 = arith.mulf %23, %27 : vector<2x32xf32>
    %c1_i32 = arith.constant 1 : i32
    %29 = vector.broadcast %c1_i32 : i32 to vector<2x1xi32>
    %30 = arith.cmpi eq, %1, %29 : vector<2x1xi32>
    %31 = vector.shape_cast %30 : vector<2x1xi1> to vector<2x1xi1>
    %32 = vector.broadcast %31 : vector<2x1xi1> to vector<2x32xi1>
    %33 = arith.select %32, %28, %10 : vector<2x32xi1>, vector<2x32xf32>
    %34 = vector.extract_strided_slice %7 {offsets = [2, 0], sizes = [2, 128], strides = [1, 1]} : vector<16x128xf32> to vector<2x128xf32>
    %cst_14 = arith.constant dense<0.000000e+00> : vector<2x128xf32>
    %35 = tpu.matmul %28, %0, %cst_14 {dimension_numbers = #tpu.dot_dimension_numbers<[1], [0], [0], [1], [0, 0, 1, 1], [], []>} : vector<2x32xf32>, vector<32x128xf32>, vector<2x128xf32> -> vector<2x128xf32>
    %36 = arith.addf %34, %35 : vector<2x128xf32>
    %37 = arith.negf %36 : vector<2x128xf32>
    %38 = math.exp %37 : vector<2x128xf32>
    %cst_15 = arith.constant 1.000000e+00 : f32
    %39 = vector.broadcast %cst_15 : f32 to vector<2x128xf32>
    %40 = arith.addf %39, %38 : vector<2x128xf32>
    %41 = arith.divf %39, %40 : vector<2x128xf32>
    %42 = math.tanh %36 : vector<2x128xf32>
    %43 = vector.extract_strided_slice %41 {offsets = [0, 0], sizes = [2, 32], strides = [1, 1]} : vector<2x128xf32> to vector<2x32xf32>
    %44 = vector.extract_strided_slice %41 {offsets = [0, 32], sizes = [2, 32], strides = [1, 1]} : vector<2x128xf32> to vector<2x32xf32>
    %45 = vector.extract_strided_slice %42 {offsets = [0, 64], sizes = [2, 32], strides = [1, 1]} : vector<2x128xf32> to vector<2x32xf32>
    %46 = vector.extract_strided_slice %41 {offsets = [0, 96], sizes = [2, 32], strides = [1, 1]} : vector<2x128xf32> to vector<2x32xf32>
    %47 = arith.mulf %44, %26 : vector<2x32xf32>
    %48 = arith.mulf %43, %45 : vector<2x32xf32>
    %49 = arith.addf %47, %48 : vector<2x32xf32>
    %50 = math.tanh %49 : vector<2x32xf32>
    %51 = arith.mulf %46, %50 : vector<2x32xf32>
    %c2_i32 = arith.constant 2 : i32
    %52 = vector.broadcast %c2_i32 : i32 to vector<2x1xi32>
    %53 = arith.cmpi eq, %1, %52 : vector<2x1xi32>
    %54 = vector.shape_cast %53 : vector<2x1xi1> to vector<2x1xi1>
    %55 = vector.broadcast %54 : vector<2x1xi1> to vector<2x32xi1>
    %56 = arith.select %55, %51, %33 : vector<2x32xi1>, vector<2x32xf32>
    %57 = vector.extract_strided_slice %7 {offsets = [4, 0], sizes = [2, 128], strides = [1, 1]} : vector<16x128xf32> to vector<2x128xf32>
    %cst_16 = arith.constant dense<0.000000e+00> : vector<2x128xf32>
    %58 = tpu.matmul %51, %0, %cst_16 {dimension_numbers = #tpu.dot_dimension_numbers<[1], [0], [0], [1], [0, 0, 1, 1], [], []>} : vector<2x32xf32>, vector<32x128xf32>, vector<2x128xf32> -> vector<2x128xf32>
    %59 = arith.addf %57, %58 : vector<2x128xf32>
    %60 = arith.negf %59 : vector<2x128xf32>
    %61 = math.exp %60 : vector<2x128xf32>
    %cst_17 = arith.constant 1.000000e+00 : f32
    %62 = vector.broadcast %cst_17 : f32 to vector<2x128xf32>
    %63 = arith.addf %62, %61 : vector<2x128xf32>
    %64 = arith.divf %62, %63 : vector<2x128xf32>
    %65 = math.tanh %59 : vector<2x128xf32>
    %66 = vector.extract_strided_slice %64 {offsets = [0, 0], sizes = [2, 32], strides = [1, 1]} : vector<2x128xf32> to vector<2x32xf32>
    %67 = vector.extract_strided_slice %64 {offsets = [0, 32], sizes = [2, 32], strides = [1, 1]} : vector<2x128xf32> to vector<2x32xf32>
    %68 = vector.extract_strided_slice %65 {offsets = [0, 64], sizes = [2, 32], strides = [1, 1]} : vector<2x128xf32> to vector<2x32xf32>
    %69 = vector.extract_strided_slice %64 {offsets = [0, 96], sizes = [2, 32], strides = [1, 1]} : vector<2x128xf32> to vector<2x32xf32>
    %70 = arith.mulf %67, %49 : vector<2x32xf32>
    %71 = arith.mulf %66, %68 : vector<2x32xf32>
    %72 = arith.addf %70, %71 : vector<2x32xf32>
    %73 = math.tanh %72 : vector<2x32xf32>
    %74 = arith.mulf %69, %73 : vector<2x32xf32>
    %c3_i32 = arith.constant 3 : i32
    %75 = vector.broadcast %c3_i32 : i32 to vector<2x1xi32>
    %76 = arith.cmpi eq, %1, %75 : vector<2x1xi32>
    %77 = vector.shape_cast %76 : vector<2x1xi1> to vector<2x1xi1>
    %78 = vector.broadcast %77 : vector<2x1xi1> to vector<2x32xi1>
    %79 = arith.select %78, %74, %56 : vector<2x32xi1>, vector<2x32xf32>
    %80 = vector.extract_strided_slice %7 {offsets = [6, 0], sizes = [2, 128], strides = [1, 1]} : vector<16x128xf32> to vector<2x128xf32>
    %cst_18 = arith.constant dense<0.000000e+00> : vector<2x128xf32>
    %81 = tpu.matmul %74, %0, %cst_18 {dimension_numbers = #tpu.dot_dimension_numbers<[1], [0], [0], [1], [0, 0, 1, 1], [], []>} : vector<2x32xf32>, vector<32x128xf32>, vector<2x128xf32> -> vector<2x128xf32>
    %82 = arith.addf %80, %81 : vector<2x128xf32>
    %83 = arith.negf %82 : vector<2x128xf32>
    %84 = math.exp %83 : vector<2x128xf32>
    %cst_19 = arith.constant 1.000000e+00 : f32
    %85 = vector.broadcast %cst_19 : f32 to vector<2x128xf32>
    %86 = arith.addf %85, %84 : vector<2x128xf32>
    %87 = arith.divf %85, %86 : vector<2x128xf32>
    %88 = math.tanh %82 : vector<2x128xf32>
    %89 = vector.extract_strided_slice %87 {offsets = [0, 0], sizes = [2, 32], strides = [1, 1]} : vector<2x128xf32> to vector<2x32xf32>
    %90 = vector.extract_strided_slice %87 {offsets = [0, 32], sizes = [2, 32], strides = [1, 1]} : vector<2x128xf32> to vector<2x32xf32>
    %91 = vector.extract_strided_slice %88 {offsets = [0, 64], sizes = [2, 32], strides = [1, 1]} : vector<2x128xf32> to vector<2x32xf32>
    %92 = vector.extract_strided_slice %87 {offsets = [0, 96], sizes = [2, 32], strides = [1, 1]} : vector<2x128xf32> to vector<2x32xf32>
    %93 = arith.mulf %90, %72 : vector<2x32xf32>
    %94 = arith.mulf %89, %91 : vector<2x32xf32>
    %95 = arith.addf %93, %94 : vector<2x32xf32>
    %96 = math.tanh %95 : vector<2x32xf32>
    %97 = arith.mulf %92, %96 : vector<2x32xf32>
    %c4_i32 = arith.constant 4 : i32
    %98 = vector.broadcast %c4_i32 : i32 to vector<2x1xi32>
    %99 = arith.cmpi eq, %1, %98 : vector<2x1xi32>
    %100 = vector.shape_cast %99 : vector<2x1xi1> to vector<2x1xi1>
    %101 = vector.broadcast %100 : vector<2x1xi1> to vector<2x32xi1>
    %102 = arith.select %101, %97, %79 : vector<2x32xi1>, vector<2x32xf32>
    %103 = vector.extract_strided_slice %7 {offsets = [8, 0], sizes = [2, 128], strides = [1, 1]} : vector<16x128xf32> to vector<2x128xf32>
    %cst_20 = arith.constant dense<0.000000e+00> : vector<2x128xf32>
    %104 = tpu.matmul %97, %0, %cst_20 {dimension_numbers = #tpu.dot_dimension_numbers<[1], [0], [0], [1], [0, 0, 1, 1], [], []>} : vector<2x32xf32>, vector<32x128xf32>, vector<2x128xf32> -> vector<2x128xf32>
    %105 = arith.addf %103, %104 : vector<2x128xf32>
    %106 = arith.negf %105 : vector<2x128xf32>
    %107 = math.exp %106 : vector<2x128xf32>
    %cst_21 = arith.constant 1.000000e+00 : f32
    %108 = vector.broadcast %cst_21 : f32 to vector<2x128xf32>
    %109 = arith.addf %108, %107 : vector<2x128xf32>
    %110 = arith.divf %108, %109 : vector<2x128xf32>
    %111 = math.tanh %105 : vector<2x128xf32>
    %112 = vector.extract_strided_slice %110 {offsets = [0, 0], sizes = [2, 32], strides = [1, 1]} : vector<2x128xf32> to vector<2x32xf32>
    %113 = vector.extract_strided_slice %110 {offsets = [0, 32], sizes = [2, 32], strides = [1, 1]} : vector<2x128xf32> to vector<2x32xf32>
    %114 = vector.extract_strided_slice %111 {offsets = [0, 64], sizes = [2, 32], strides = [1, 1]} : vector<2x128xf32> to vector<2x32xf32>
    %115 = vector.extract_strided_slice %110 {offsets = [0, 96], sizes = [2, 32], strides = [1, 1]} : vector<2x128xf32> to vector<2x32xf32>
    %116 = arith.mulf %113, %95 : vector<2x32xf32>
    %117 = arith.mulf %112, %114 : vector<2x32xf32>
    %118 = arith.addf %116, %117 : vector<2x32xf32>
    %119 = math.tanh %118 : vector<2x32xf32>
    %120 = arith.mulf %115, %119 : vector<2x32xf32>
    %c5_i32 = arith.constant 5 : i32
    %121 = vector.broadcast %c5_i32 : i32 to vector<2x1xi32>
    %122 = arith.cmpi eq, %1, %121 : vector<2x1xi32>
    %123 = vector.shape_cast %122 : vector<2x1xi1> to vector<2x1xi1>
    %124 = vector.broadcast %123 : vector<2x1xi1> to vector<2x32xi1>
    %125 = arith.select %124, %120, %102 : vector<2x32xi1>, vector<2x32xf32>
    %126 = vector.extract_strided_slice %7 {offsets = [10, 0], sizes = [2, 128], strides = [1, 1]} : vector<16x128xf32> to vector<2x128xf32>
    %cst_22 = arith.constant dense<0.000000e+00> : vector<2x128xf32>
    %127 = tpu.matmul %120, %0, %cst_22 {dimension_numbers = #tpu.dot_dimension_numbers<[1], [0], [0], [1], [0, 0, 1, 1], [], []>} : vector<2x32xf32>, vector<32x128xf32>, vector<2x128xf32> -> vector<2x128xf32>
    %128 = arith.addf %126, %127 : vector<2x128xf32>
    %129 = arith.negf %128 : vector<2x128xf32>
    %130 = math.exp %129 : vector<2x128xf32>
    %cst_23 = arith.constant 1.000000e+00 : f32
    %131 = vector.broadcast %cst_23 : f32 to vector<2x128xf32>
    %132 = arith.addf %131, %130 : vector<2x128xf32>
    %133 = arith.divf %131, %132 : vector<2x128xf32>
    %134 = math.tanh %128 : vector<2x128xf32>
    %135 = vector.extract_strided_slice %133 {offsets = [0, 0], sizes = [2, 32], strides = [1, 1]} : vector<2x128xf32> to vector<2x32xf32>
    %136 = vector.extract_strided_slice %133 {offsets = [0, 32], sizes = [2, 32], strides = [1, 1]} : vector<2x128xf32> to vector<2x32xf32>
    %137 = vector.extract_strided_slice %134 {offsets = [0, 64], sizes = [2, 32], strides = [1, 1]} : vector<2x128xf32> to vector<2x32xf32>
    %138 = vector.extract_strided_slice %133 {offsets = [0, 96], sizes = [2, 32], strides = [1, 1]} : vector<2x128xf32> to vector<2x32xf32>
    %139 = arith.mulf %136, %118 : vector<2x32xf32>
    %140 = arith.mulf %135, %137 : vector<2x32xf32>
    %141 = arith.addf %139, %140 : vector<2x32xf32>
    %142 = math.tanh %141 : vector<2x32xf32>
    %143 = arith.mulf %138, %142 : vector<2x32xf32>
    %c6_i32 = arith.constant 6 : i32
    %144 = vector.broadcast %c6_i32 : i32 to vector<2x1xi32>
    %145 = arith.cmpi eq, %1, %144 : vector<2x1xi32>
    %146 = vector.shape_cast %145 : vector<2x1xi1> to vector<2x1xi1>
    %147 = vector.broadcast %146 : vector<2x1xi1> to vector<2x32xi1>
    %148 = arith.select %147, %143, %125 : vector<2x32xi1>, vector<2x32xf32>
    %149 = vector.extract_strided_slice %7 {offsets = [12, 0], sizes = [2, 128], strides = [1, 1]} : vector<16x128xf32> to vector<2x128xf32>
    %cst_24 = arith.constant dense<0.000000e+00> : vector<2x128xf32>
    %150 = tpu.matmul %143, %0, %cst_24 {dimension_numbers = #tpu.dot_dimension_numbers<[1], [0], [0], [1], [0, 0, 1, 1], [], []>} : vector<2x32xf32>, vector<32x128xf32>, vector<2x128xf32> -> vector<2x128xf32>
    %151 = arith.addf %149, %150 : vector<2x128xf32>
    %152 = arith.negf %151 : vector<2x128xf32>
    %153 = math.exp %152 : vector<2x128xf32>
    %cst_25 = arith.constant 1.000000e+00 : f32
    %154 = vector.broadcast %cst_25 : f32 to vector<2x128xf32>
    %155 = arith.addf %154, %153 : vector<2x128xf32>
    %156 = arith.divf %154, %155 : vector<2x128xf32>
    %157 = math.tanh %151 : vector<2x128xf32>
    %158 = vector.extract_strided_slice %156 {offsets = [0, 0], sizes = [2, 32], strides = [1, 1]} : vector<2x128xf32> to vector<2x32xf32>
    %159 = vector.extract_strided_slice %156 {offsets = [0, 32], sizes = [2, 32], strides = [1, 1]} : vector<2x128xf32> to vector<2x32xf32>
    %160 = vector.extract_strided_slice %157 {offsets = [0, 64], sizes = [2, 32], strides = [1, 1]} : vector<2x128xf32> to vector<2x32xf32>
    %161 = vector.extract_strided_slice %156 {offsets = [0, 96], sizes = [2, 32], strides = [1, 1]} : vector<2x128xf32> to vector<2x32xf32>
    %162 = arith.mulf %159, %141 : vector<2x32xf32>
    %163 = arith.mulf %158, %160 : vector<2x32xf32>
    %164 = arith.addf %162, %163 : vector<2x32xf32>
    %165 = math.tanh %164 : vector<2x32xf32>
    %166 = arith.mulf %161, %165 : vector<2x32xf32>
    %c7_i32 = arith.constant 7 : i32
    %167 = vector.broadcast %c7_i32 : i32 to vector<2x1xi32>
    %168 = arith.cmpi eq, %1, %167 : vector<2x1xi32>
    %169 = vector.shape_cast %168 : vector<2x1xi1> to vector<2x1xi1>
    %170 = vector.broadcast %169 : vector<2x1xi1> to vector<2x32xi1>
    %171 = arith.select %170, %166, %148 : vector<2x32xi1>, vector<2x32xf32>
    %172 = vector.extract_strided_slice %7 {offsets = [14, 0], sizes = [2, 128], strides = [1, 1]} : vector<16x128xf32> to vector<2x128xf32>
    %cst_26 = arith.constant dense<0.000000e+00> : vector<2x128xf32>
    %173 = tpu.matmul %166, %0, %cst_26 {dimension_numbers = #tpu.dot_dimension_numbers<[1], [0], [0], [1], [0, 0, 1, 1], [], []>} : vector<2x32xf32>, vector<32x128xf32>, vector<2x128xf32> -> vector<2x128xf32>
    %174 = arith.addf %172, %173 : vector<2x128xf32>
    %175 = arith.negf %174 : vector<2x128xf32>
    %176 = math.exp %175 : vector<2x128xf32>
    %cst_27 = arith.constant 1.000000e+00 : f32
    %177 = vector.broadcast %cst_27 : f32 to vector<2x128xf32>
    %178 = arith.addf %177, %176 : vector<2x128xf32>
    %179 = arith.divf %177, %178 : vector<2x128xf32>
    %180 = math.tanh %174 : vector<2x128xf32>
    %181 = vector.extract_strided_slice %179 {offsets = [0, 0], sizes = [2, 32], strides = [1, 1]} : vector<2x128xf32> to vector<2x32xf32>
    %182 = vector.extract_strided_slice %179 {offsets = [0, 32], sizes = [2, 32], strides = [1, 1]} : vector<2x128xf32> to vector<2x32xf32>
    %183 = vector.extract_strided_slice %180 {offsets = [0, 64], sizes = [2, 32], strides = [1, 1]} : vector<2x128xf32> to vector<2x32xf32>
    %184 = vector.extract_strided_slice %179 {offsets = [0, 96], sizes = [2, 32], strides = [1, 1]} : vector<2x128xf32> to vector<2x32xf32>
    %185 = arith.mulf %182, %164 : vector<2x32xf32>
    %186 = arith.mulf %181, %183 : vector<2x32xf32>
    %187 = arith.addf %185, %186 : vector<2x32xf32>
    %188 = math.tanh %187 : vector<2x32xf32>
    %189 = arith.mulf %184, %188 : vector<2x32xf32>
    %c8_i32 = arith.constant 8 : i32
    %190 = vector.broadcast %c8_i32 : i32 to vector<2x1xi32>
    %191 = arith.cmpi eq, %1, %190 : vector<2x1xi32>
    %192 = vector.shape_cast %191 : vector<2x1xi1> to vector<2x1xi1>
    %193 = vector.broadcast %192 : vector<2x1xi1> to vector<2x32xi1>
    %194 = arith.select %193, %189, %171 : vector<2x32xi1>, vector<2x32xf32>
    %cst_28 = arith.constant dense<-2147483648> : vector<1xi32>
    %195 = vector.multi_reduction <maxsi>, %1, %cst_28 [0] : vector<2x1xi32> to vector<1xi32>
    %196 = vector.shape_cast %195 : vector<1xi32> to vector<1x1xi32>
    %197 = vector.broadcast %196 : vector<1x1xi32> to vector<2x1xi32>
    %198 = arith.cmpi eq, %1, %197 : vector<2x1xi32>
    %199 = arith.extui %198 : vector<2x1xi1> to vector<2x1xi32>
    %200 = arith.sitofp %199 : vector<2x1xi32> to vector<2x1xf32>
    %201 = vector.broadcast %200 : vector<2x1xf32> to vector<2x32xf32>
    %202 = arith.mulf %194, %201 : vector<2x32xf32>
    %c0_29 = arith.constant 0 : index
    %c0_30 = arith.constant 0 : index
    %203 = vector.load %arg5[%c0_29, %c0_30] : memref<32x16xf32, #tpu.memory_space<vmem>>, vector<32x16xf32>
    %cst_31 = arith.constant dense<0.000000e+00> : vector<2x16xf32>
    %204 = tpu.matmul %202, %203, %cst_31 {dimension_numbers = #tpu.dot_dimension_numbers<[1], [0], [0], [1], [0, 0, 1, 1], [], []>} : vector<2x32xf32>, vector<32x16xf32>, vector<2x16xf32> -> vector<2x16xf32>
    %c0_32 = arith.constant 0 : index
    %c0_33 = arith.constant 0 : index
    %205 = vector.load %arg6[%c0_32, %c0_33] : memref<1x16xf32, #tpu.memory_space<vmem>>, vector<1x16xf32>
    %206 = vector.broadcast %205 : vector<1x16xf32> to vector<2x16xf32>
    %207 = arith.addf %204, %206 : vector<2x16xf32>
    %cst_34 = arith.constant 0.000000e+00 : f32
    %208 = vector.broadcast %cst_34 : f32 to vector<2x16xf32>
    %209 = arith.maximumf %207, %208 : vector<2x16xf32>
    %c0_35 = arith.constant 0 : index
    %c0_36 = arith.constant 0 : index
    %210 = vector.load %arg7[%c0_35, %c0_36] : memref<1x16xf32, #tpu.memory_space<vmem>>, vector<1x16xf32>
    %211 = vector.broadcast %210 : vector<1x16xf32> to vector<2x16xf32>
    %212 = arith.mulf %209, %211 : vector<2x16xf32>
    %cst_37 = arith.constant dense<0.000000e+00> : vector<2xf32>
    %213 = vector.multi_reduction <add>, %212, %cst_37 [1] : vector<2x16xf32> to vector<2xf32>
    %214 = vector.shape_cast %213 : vector<2xf32> to vector<2x1xf32>
    %c0_38 = arith.constant 0 : index
    %c0_39 = arith.constant 0 : index
    %215 = vector.load %arg8[%c0_38, %c0_39] : memref<1x1xf32, #tpu.memory_space<vmem>>, vector<1x1xf32>
    %216 = vector.broadcast %215 : vector<1x1xf32> to vector<2x1xf32>
    %217 = arith.addf %214, %216 : vector<2x1xf32>
    %218 = arith.negf %217 : vector<2x1xf32>
    %219 = math.exp %218 : vector<2x1xf32>
    %cst_40 = arith.constant 1.000000e+00 : f32
    %220 = vector.broadcast %cst_40 : f32 to vector<2x1xf32>
    %221 = arith.addf %220, %219 : vector<2x1xf32>
    %222 = arith.divf %220, %221 : vector<2x1xf32>
    %c0_41 = arith.constant 0 : index
    %c0_42 = arith.constant 0 : index
    %223 = vector.load %arg9[%c0_41, %c0_42] : memref<2x1xf32, #tpu.memory_space<vmem>>, vector<2x1xf32>
    tpu.vector_store %arg9[%c0_41, %c0_42], %222 {strides = array<i32>} : memref<2x1xf32, #tpu.memory_space<vmem>>, vector<2x1xf32>,
    return
  }
}

</mosaic_0001>

<bundles_post_ra>
// kernel: tpu_custom_call.1
= control target key start
LH: loop header
LB: loop body
LE: loop exit
PB: predicated region body
PF: predicated region fallthrough
CT: control target
= control target key end

     0   :  { %vm49_vm0 = vcmask 64512   ;;  %v1495_v0 = vmov 0.0|0.0   ;;  %vm1496_vm1 = vmmov 0   ;;  %v1497_v4 = vmov 0.0   ;;  %s1498_s22 = smov 64   ;;  %s1774_s3 = inlined_call_operand.vmem [shape: f32[32,128], index: 3, kind: input, shape index: {}]   ;;  %s1775_s2 = inlined_call_operand.vmem [shape: f32[8,128], index: 2, kind: input, shape index: {}]   ;;  %s1776_s0 = inlined_call_operand.vmem [shape: f32[16,8], index: 0, kind: input, shape index: {}]   ;;  %s1777_s4 = inlined_call_operand.vmem [shape: f32[1,128], index: 4, kind: input, shape index: {}]   ;;  %s1778_s1 = inlined_call_operand.vmem [shape: s32[2,1], index: 1, kind: input, shape index: {}]   ;;  %s1779_s5 = inlined_call_operand.vmem [shape: f32[32,16], index: 5, kind: input, shape index: {}]   ;;  %s1780_s8 = inlined_call_operand.<no memory space> [shape: f32[1,1], index: 8, kind: input, shape index: {}]   ;;  %s1781_s6 = inlined_call_operand.vmem [shape: f32[1,16], index: 6, kind: input, shape index: {}]   ;;  %s1782_s7 = inlined_call_operand.vmem [shape: f32[1,16], index: 7, kind: input, shape index: {}]   ;;  %s1783_s9 = inlined_call_operand.vmem [shape: f32[2,1], index: 9, kind: output, shape index: {}]  }
   0x1   :  { %1364 = vmatprep.subr.bf16.mxu1 %v1495_v0  ;;  %v34_v1 = vld [vmem:[%s1774_s3] sm:$0xff]  ;;  %v35_v2 = vld [vmem:[%s1774_s3 + $0x8] sm:$0xff]  ;;  %1273 = vmatprep.mubr.msk.f32.mxu1 %vm1496_vm1, %v1497_v4  ;;  %v36_v8 = vld [vmem:[%s1774_s3 + $0x10] sm:$0xff]  ;;  %vm131_vm2 = vcmask 261120   ;;  %vm1052_vm9 = vcmask 1024  }
   0x2   :  { %v41_v3 = vld [vmem:[%s1775_s2] sm:$0xff]  ;;  %v1564_v5 = vpack.c.bf16 %v35_v2, %v34_v1  ;;  %v40_v7 = vld [vmem:[%s1776_s0 + $0x8] sm:$0xff]  ;;  %v37_v9 = vld [vmem:[%s1774_s3 + $0x18] sm:$0xff] }
   0x3   :  { %1260 = vmatprep.subr.mxu0 %v41_v3  ;;  %v39_v6 = vld [vmem:[%s1776_s0] sm:$0xff]  ;;  %v1581_v10 = vpack.c.bf16 %v37_v9, %v36_v8 }
   0x4   :  { %1261 = vmatpush3.msra.mxu0 %v41_v3  ;;  %1262 = vmatprep.mubr.msk.f32.mxu0 %vm49_vm0, %v39_v6  ;;  %v1188_v11 = vld [vmem:[%s1777_s4] ss:$0 sm:$0xff]  ;;  %s1499_s4 = smov 32  }
   0x5   :  { %1366 = vmatpush3.bf16.msra.mxu1 %v1564_v5  ;;  %1263 = vmatmul.mubr.msk.f32.vlgmr.msra.gmra.mrb[0].mxu0 %vm49_vm0, %v40_v7 }
   0x6   :  { %1367 = vmatprep.subr.bf16.mxu1 %v1495_v0  ;;  %1370 = vmatprep.subr.bf16.mxu0 %v1495_v0 }
   0x7   :  { %1372 = vmatpush3.bf16.msra.mxu0 %v1564_v5  ;;  %1284 = vmatprep.mubr.msk.f32.mxu0 %vm1496_vm1, %v1497_v4 }
   0x8   :  { %1373 = vmatprep.subr.bf16.mxu0 %v1495_v0 }
   0x9   :  { %1369 = vmatpush3.bf16.msra.mxu1 %v1581_v10 }
   0xa   :  { %1376 = vmatprep.subr.bf16.mxu1 %v1495_v0 }
   0xb   :  { %1375 = vmatpush3.bf16.msra.mxu0 %v1581_v10 }
   0xc   :  { %1274 = vmatmul.mubr.f32.vlgmr.msra.gmra.mrb[0].mxu1 %v1497_v4  ;;  %1382 = vmatprep.subr.bf16.mxu0 %v1495_v0 }
   0xd   :  { %1378 = vmatpush3.bf16.msra.mxu1 %v1564_v5  ;;  %1295 = vmatprep.mubr.msk.f32.mxu1 %vm1496_vm1, %v1497_v4 }
   0xe   :  { %1379 = vmatprep.subr.bf16.mxu1 %v1495_v0 }
  0x11   :  { %1381 = vmatpush3.bf16.msra.mxu1 %v1581_v10 }
  0x12   :  { %1388 = vmatprep.subr.bf16.mxu1 %v1495_v0 }
  0xd8   :  { %v1264_v12 = vpop.f32.mrb[0].mxu0 }
  0xd9   :  { %v1603_v13 = vadd.f32 %v1264_v12, %v1188_v11  ;;  %v122_v14 = vpop.f32.mrb[1].mxu0 }
  0xda   :  { %v1605_v15 = vadd.f32 %v1188_v11, %v122_v14 }
  0xdf   :  { %v201_v16 = vpop.f32.mrb[0].mxu1 }
  0xe0   :  { %v205_v17 = vadd.f32 %v201_v16, %v1605_v15  ;;  %v1275_v18 = vpop.f32.mrb[1].mxu1 }
  0xe2   :  { %1427 = vtanh.f32 %v205_v17  ;;  %v1191_v20 = vmul.f32 -1.442695, %v205_v17 }
  0xe4   :  { %1429 = vpow2.f32 %v1191_v20 }
  0xec   :  { %v1428_v19 = vpop.eup %1427 }
  0xed   :  { %215 = vrot.lane.b32.xlu0 %v1428_v19, %s1498_s22 }
  0xee   :  { %v1430_v21 = vpop.eup %1429 }
  0xef   :  { %v209_v22 = vadd.f32 1.0, %v1430_v21 }
  0xf1   :  { %1431 = vrcp.f32 %v209_v22 }
  0xfb   :  { %v1432_v23 = vpop.eup %1431 }
  0xfc   :  { %v213_v26 = vmul.f32 0.0, %v1432_v23 }
 0x15f   :  { %v216_v24 = vpop.permute.xlu0 %215 }
 0x160   :  { %v218_v25 = vmul.f32 %v1432_v23, %v216_v24 }
 0x162   :  { %220 = vrot.lane.b32.xlu0 %v218_v25, %s1499_s4 }
 0x1d4   :  { %v221_v27 = vpop.permute.xlu0 %220 }
 0x1d5   :  { %v223_v28 = vadd.f32 %v221_v27, %v213_v26 }
 0x1d7   :  { %1433 = vtanh.f32 %v223_v28  ;;  %v324_v44 = vrot.slane %v223_v28, 6 }
 0x1e1   :  { %v1434_v29 = vpop.eup %1433 }
 0x1e2   :  { %226 = vrot.lane.b32.xlu1 %v1434_v29, %s1498_s22 }
 0x254   :  { %v227_v30 = vpop.permute.xlu1 %226 }
 0x255   :  { %v1611_v31 = vmul.f32 %v1432_v23, %v227_v30 }
 0x257   :  { %238 = vrot.lane.b32.xlu1 %v1611_v31, %s1499_s4 }
 0x2c9   :  { %v239_v32 = vpop.permute.xlu1 %238 }
 0x2ca   :  { %1285 = vmatmul.mubr.msk.f32.vlgmr.msra.gmra.mrb[2].mxu0 %vm131_vm2, %v239_v32 }
 0x2cb   :  { %1384 = vmatpush3.bf16.msra.mxu0 %v1564_v5  ;;  %1306 = vmatprep.mubr.msk.f32.mxu0 %vm1496_vm1, %v1497_v4 }
 0x2cc   :  { %1385 = vmatprep.subr.bf16.mxu0 %v1495_v0 }
 0x2cf   :  { %1387 = vmatpush3.bf16.msra.mxu0 %v1581_v10 }
 0x2d0   :  { %1394 = vmatprep.subr.bf16.mxu0 %v1495_v0 }
 0x39d   :  { %v308_v33 = vpop.f32.mrb[2].mxu0 }
 0x39e   :  { %v313_v34 = vrot.slane %v308_v33, 6  ;;  %v1286_v35 = vpop.f32.mrb[3].mxu0 }
 0x3a0   :  { %v315_v36 = vadd.f32 %v313_v34, %v1605_v15 }
 0x3a2   :  { %1435 = vtanh.f32 %v315_v36  ;;  %v1193_v38 = vmul.f32 -1.442695, %v315_v36 }
 0x3a4   :  { %1437 = vpow2.f32 %v1193_v38 }
 0x3ac   :  { %v1436_v37 = vpop.eup %1435 }
 0x3ad   :  { %328 = vrot.lane.b32.xlu0 %v1436_v37, %s1498_s22 }
 0x3ae   :  { %v1438_v39 = vpop.eup %1437 }
 0x3af   :  { %v319_v40 = vadd.f32 1.0, %v1438_v39 }
 0x3b1   :  { %1439 = vrcp.f32 %v319_v40 }
 0x3bb   :  { %v1440_v41 = vpop.eup %1439 }
 0x3bc   :  { %v326_v45 = vmul.f32 %v1440_v41, %v324_v44 }
 0x41f   :  { %v329_v42 = vpop.permute.xlu0 %328 }
 0x420   :  { %v331_v43 = vmul.f32 %v1440_v41, %v329_v42 }
 0x422   :  { %333 = vrot.lane.b32.xlu1 %v331_v43, %s1499_s4 }
 0x494   :  { %v334_v46 = vpop.permute.xlu1 %333 }
 0x495   :  { %v336_v47 = vadd.f32 %v334_v46, %v326_v45 }
 0x497   :  { %1441 = vtanh.f32 %v336_v47  ;;  %v443_v1 = vrot.slane %v336_v47, 6 }
 0x4a1   :  { %v1442_v48 = vpop.eup %1441 }
 0x4a2   :  { %339 = vrot.lane.b32.xlu0 %v1442_v48, %s1498_s22 }
 0x514   :  { %v340_v49 = vpop.permute.xlu0 %339 }
 0x515   :  { %v342_v50 = vmul.f32 %v1440_v41, %v340_v49 }
 0x517   :  { %v350_v51 = vrot.slane %v342_v50, 2 }
 0x519   :  { %351 = vrot.lane.b32.xlu1 %v350_v51, %s1499_s4 }
 0x58b   :  { %v1627_v52 = vpop.permute.xlu1 %351 }
 0x58c   :  { %1296 = vmatmul.mubr.msk.f32.vlgmr.msra.gmra.mrb[2].mxu1 %vm131_vm2, %v1627_v52 }
 0x58d   :  { %1390 = vmatpush3.bf16.msra.mxu1 %v1564_v5  ;;  %1317 = vmatprep.mubr.msk.f32.mxu1 %vm1496_vm1, %v1497_v4 }
 0x58e   :  { %1391 = vmatprep.subr.bf16.mxu1 %v1495_v0 }
 0x591   :  { %1393 = vmatpush3.bf16.msra.mxu1 %v1581_v10 }
 0x592   :  { %1400 = vmatprep.subr.bf16.mxu1 %v1495_v0 }
 0x65f   :  { %v427_v53 = vpop.f32.mrb[2].mxu1 }
 0x660   :  { %v432_v54 = vrot.slane %v427_v53, 4  ;;  %v1297_v55 = vpop.f32.mrb[3].mxu1 }
 0x662   :  { %v434_v56 = vadd.f32 %v432_v54, %v1605_v15 }
 0x664   :  { %1443 = vtanh.f32 %v434_v56  ;;  %v1195_v58 = vmul.f32 -1.442695, %v434_v56 }
 0x666   :  { %1445 = vpow2.f32 %v1195_v58 }
 0x66e   :  { %v1444_v57 = vpop.eup %1443 }
 0x66f   :  { %447 = vrot.lane.b32.xlu0 %v1444_v57, %s1498_s22 }
 0x670   :  { %v1446_v59 = vpop.eup %1445 }
 0x671   :  { %v438_v60 = vadd.f32 1.0, %v1446_v59 }
 0x673   :  { %1447 = vrcp.f32 %v438_v60 }
 0x67d   :  { %v1448_v61 = vpop.eup %1447 }
 0x67e   :  { %v445_v2 = vmul.f32 %v1448_v61, %v443_v1 }
 0x6e1   :  { %v448_v62 = vpop.permute.xlu0 %447 }
 0x6e2   :  { %v450_v63 = vmul.f32 %v1448_v61, %v448_v62 }
 0x6e4   :  { %452 = vrot.lane.b32.xlu1 %v450_v63, %s1499_s4 }
 0x756   :  { %v453_v3 = vpop.permute.xlu1 %452 }
 0x757   :  { %v455_v6 = vadd.f32 %v453_v3, %v445_v2 }
 0x759   :  { %1449 = vtanh.f32 %v455_v6  ;;  %v558_v26 = vrot.slane %v455_v6, 6 }
 0x763   :  { %v1450_v7 = vpop.eup %1449 }
 0x764   :  { %458 = vrot.lane.b32.xlu0 %v1450_v7, %s1498_s22 }
 0x7d6   :  { %v459_v8 = vpop.permute.xlu0 %458 }
 0x7d7   :  { %v461_v9 = vmul.f32 %v1448_v61, %v459_v8 }
 0x7d9   :  { %v469_v11 = vrot.slane %v461_v9, 4 }
 0x7db   :  { %470 = vrot.lane.b32.xlu1 %v469_v11, %s1499_s4 }
 0x84d   :  { %v1642_v12 = vpop.permute.xlu1 %470 }
 0x84e   :  { %1307 = vmatmul.mubr.msk.f32.vlgmr.msra.gmra.mrb[4].mxu0 %vm131_vm2, %v1642_v12 }
 0x84f   :  { %1396 = vmatpush3.bf16.msra.mxu0 %v1564_v5  ;;  %1328 = vmatprep.mubr.msk.f32.mxu0 %vm1496_vm1, %v1497_v4 }
 0x850   :  { %1397 = vmatprep.subr.bf16.mxu0 %v1495_v0 }
 0x853   :  { %1399 = vmatpush3.bf16.msra.mxu0 %v1581_v10 }
 0x854   :  { %1406 = vmatprep.subr.bf16.mxu0 %v1495_v0 }
 0x921   :  { %v542_v14 = vpop.f32.mrb[4].mxu0 }
 0x922   :  { %v547_v16 = vrot.slane %v542_v14, 2  ;;  %v1308_v17 = vpop.f32.mrb[5].mxu0 }
 0x924   :  { %v549_v18 = vadd.f32 %v547_v16, %v1605_v15 }
 0x926   :  { %1451 = vtanh.f32 %v549_v18  ;;  %v1197_v20 = vmul.f32 -1.442695, %v549_v18 }
 0x928   :  { %1453 = vpow2.f32 %v1197_v20 }
 0x930   :  { %v1452_v19 = vpop.eup %1451 }
 0x931   :  { %562 = vrot.lane.b32.xlu0 %v1452_v19, %s1498_s22 }
 0x932   :  { %v1454_v21 = vpop.eup %1453 }
 0x933   :  { %v553_v22 = vadd.f32 1.0, %v1454_v21 }
 0x935   :  { %1455 = vrcp.f32 %v553_v22 }
 0x93f   :  { %v1456_v23 = vpop.eup %1455 }
 0x940   :  { %v560_v27 = vmul.f32 %v1456_v23, %v558_v26 }
 0x9a3   :  { %v563_v24 = vpop.permute.xlu0 %562 }
 0x9a4   :  { %v565_v25 = vmul.f32 %v1456_v23, %v563_v24 }
 0x9a6   :  { %567 = vrot.lane.b32.xlu1 %v565_v25, %s1499_s4 }
 0xa18   :  { %v568_v28 = vpop.permute.xlu1 %567 }
 0xa19   :  { %v570_v29 = vadd.f32 %v568_v28, %v560_v27 }
 0xa1b   :  { %1457 = vtanh.f32 %v570_v29  ;;  %v670_v45 = vrot.slane %v570_v29, 6 }
 0xa25   :  { %v1458_v15 = vpop.eup %1457 }
 0xa26   :  { %573 = vrot.lane.b32.xlu0 %v1458_v15, %s1498_s22  ;;  %v1500_v15 = vmov 0  }
 0xa27   :  { %1425 = vset.pattern.permute.xlu1 %v1500_v15  ;;  %1426 = vset.pattern.permute.xlu0 %v1500_v15 }
 0xa98   :  { %v574_v30 = vpop.permute.xlu0 %573 }
 0xa99   :  { %v576_v32 = vmul.f32 %v1456_v23, %v574_v30 }
 0xa9b   :  { %v584_v33 = vrot.slane %v576_v32, 6 }
 0xa9d   :  { %585 = vrot.lane.b32.xlu1 %v584_v33, %s1499_s4  ;;  %v1701_v33 = vld [vmem:[%s1778_s1] sm:$0x3]  ;;  %s1501_s1 = smov 96  }
 0xa9e   :  { %vm230_vm3 = vcmp.eq.s32.totalorder %v1701_v33, 1  ;;  %vm343_vm4 = vcmp.eq.s32.totalorder %v1701_v33, 2  ;;  %vm577_vm5 = vcmp.eq.s32.totalorder %v1701_v33, 4  ;;  %vm462_vm7 = vcmp.eq.s32.totalorder %v1701_v33, 3 }
 0xa9f   :  { %vm689_vm8 = vcmp.eq.s32.totalorder %v1701_v33, 5  ;;  %vm806_vm12 = vcmp.eq.s32.totalorder %v1701_v33, 6  ;;  %vm1040_vm14 = vcmp.eq.s32.totalorder %v1701_v33, 8 }
 0xb0f   :  { %v1657_v34 = vpop.permute.xlu1 %585 }
 0xb10   :  { %1318 = vmatmul.mubr.msk.f32.vlgmr.msra.gmra.mrb[4].mxu1 %vm131_vm2, %v1657_v34 }
 0xb11   :  { %1402 = vmatpush3.bf16.msra.mxu1 %v1564_v5  ;;  %1339 = vmatprep.mubr.msk.f32.mxu1 %vm1496_vm1, %v1497_v4 }
 0xb12   :  { %1403 = vmatprep.subr.bf16.mxu1 %v1495_v0 }
 0xb15   :  { %1405 = vmatpush3.bf16.msra.mxu1 %v1581_v10 }
 0xb16   :  { %1412 = vmatprep.subr.bf16.mxu1 %v1495_v0 }
 0xbe3   :  { %v657_v35 = vpop.f32.mrb[4].mxu1 }
 0xbe4   :  { %v661_v36 = vadd.f32 %v657_v35, %v1603_v13  ;;  %v1319_v37 = vpop.f32.mrb[5].mxu1 }
 0xbe5   :  { %v231_v37 = vsel %vm230_vm3, 1, %v1500_v15  ;;  %vm925_vm3 = vcmp.eq.s32.totalorder %v1701_v33, 7 }
 0xbe6   :  { %1459 = vtanh.f32 %v661_v36  ;;  %v1199_v39 = vmul.f32 -1.442695, %v661_v36 }
 0xbe8   :  { %1461 = vpow2.f32 %v1199_v39  ;;  %v578_v39 = vsel %vm577_vm5, 1, %v1500_v15 }
 0xbf0   :  { %v1460_v38 = vpop.eup %1459 }
 0xbf1   :  { %674 = vrot.lane.b32.xlu0 %v1460_v38, %s1498_s22  ;;  %v344_v38 = vsel %vm343_vm4, 1, %v1500_v15 }
 0xbf2   :  { %v1462_v40 = vpop.eup %1461 }
 0xbf3   :  { %v665_v41 = vadd.f32 1.0, %v1462_v40 }
 0xbf5   :  { %1463 = vrcp.f32 %v665_v41 }
 0xbff   :  { %v1464_v42 = vpop.eup %1463 }
 0xc00   :  { %v672_v46 = vmul.f32 %v1464_v42, %v670_v45 }
 0xc63   :  { %v675_v43 = vpop.permute.xlu0 %674 }
 0xc64   :  { %v677_v44 = vmul.f32 %v1464_v42, %v675_v43 }
 0xc66   :  { %679 = vrot.lane.b32.xlu1 %v677_v44, %s1499_s4 }
 0xcd8   :  { %v680_v47 = vpop.permute.xlu1 %679 }
 0xcd9   :  { %v682_v48 = vadd.f32 %v680_v47, %v672_v46 }
 0xcdb   :  { %1465 = vtanh.f32 %v682_v48 }
 0xce5   :  { %v1466_v49 = vpop.eup %1465 }
 0xce6   :  { %685 = vrot.lane.b32.xlu0 %v1466_v49, %s1498_s22 }
 0xd58   :  { %v686_v50 = vpop.permute.xlu0 %685 }
 0xd59   :  { %v1671_v51 = vmul.f32 %v1464_v42, %v686_v50 }
 0xd5b   :  { %701 = vrot.lane.b32.xlu1 %v1671_v51, %s1499_s4 }
 0xdcd   :  { %v702_v53 = vpop.permute.xlu1 %701 }
 0xdce   :  { %1329 = vmatmul.mubr.msk.f32.vlgmr.msra.gmra.mrb[6].mxu0 %vm131_vm2, %v702_v53 }
 0xdcf   :  { %1408 = vmatpush3.bf16.msra.mxu0 %v1564_v5  ;;  %1350 = vmatprep.mubr.msk.f32.mxu0 %vm1496_vm1, %v1497_v4 }
 0xdd0   :  { %1409 = vmatprep.subr.bf16.mxu0 %v1495_v0 }
 0xdd3   :  { %1411 = vmatpush3.bf16.msra.mxu0 %v1581_v10  ;;  %v787_v10 = vrot.slane %v682_v48, 6 }
 0xea1   :  { %v771_v54 = vpop.f32.mrb[6].mxu0 }
 0xea2   :  { %v776_v55 = vrot.slane %v771_v54, 6  ;;  %v1330_v56 = vpop.f32.mrb[7].mxu0 }
 0xea3   :  { %v1053_v56 = vsel %vm1052_vm9, %v1701_v33, 2147483648 }
 0xea4   :  { %v778_v57 = vadd.f32 %v776_v55, %v1603_v13  ;;  %v690_v55 = vsel %vm689_vm8, 1, %v1500_v15 }
 0xea6   :  { %1467 = vtanh.f32 %v778_v57  ;;  %v1201_v59 = vmul.f32 -1.442695, %v778_v57  ;;  %v1054_v57 = vrot.slane %v1053_v56, 4 }
 0xea8   :  { %1469 = vpow2.f32 %v1201_v59  ;;  %vm1055_vm10 = vcmp.gt.s32.totalorder %v1053_v56, %v1054_v57 }
 0xeb0   :  { %v1468_v58 = vpop.eup %1467 }
 0xeb1   :  { %791 = vrot.lane.b32.xlu0 %v1468_v58, %s1498_s22 }
 0xeb2   :  { %v1470_v60 = vpop.eup %1469 }
 0xeb3   :  { %v782_v5 = vadd.f32 1.0, %v1470_v60 }
 0xeb5   :  { %1471 = vrcp.f32 %v782_v5  ;;  %v1056_v5 = vsel %vm1055_vm10, %v1053_v56, %v1054_v57  ;;  %vm1165_vm10 = vcmask 123904  }
 0xebf   :  { %v1472_v61 = vpop.eup %1471 }
 0xec0   :  { %v789_v1 = vmul.f32 %v1472_v61, %v787_v10 }
 0xf23   :  { %v792_v62 = vpop.permute.xlu0 %791 }
 0xf24   :  { %v794_v63 = vmul.f32 %v1472_v61, %v792_v62 }
 0xf26   :  { %796 = vrot.lane.b32.xlu1 %v794_v63, %s1499_s4  ;;  %v1057_v63 = vrot.slane %v1056_v5, 2 }
 0xf28   :  { %vm1058_vm11 = vcmp.gt.s32.totalorder %v1056_v5, %v1057_v63 }
 0xf98   :  { %v797_v2 = vpop.permute.xlu1 %796 }
 0xf99   :  { %v799_v3 = vadd.f32 %v797_v2, %v789_v1  ;;  %v1059_v1 = vsel %vm1058_vm11, %v1056_v5, %v1057_v63 }
 0xf9b   :  { %1473 = vtanh.f32 %v799_v3  ;;  %v906_v26 = vrot.slane %v799_v3, 6  ;;  %v1060_v3 = vrot.slane %v1059_v1, 1 }
 0xf9d   :  { %vm1061_vm15 = vcmp.gt.s32.totalorder %v1059_v1, %v1060_v3 }
 0xfa5   :  { %v1474_v6 = vpop.eup %1473 }
 0xfa6   :  { %802 = vrot.lane.b32.xlu0 %v1474_v6, %s1498_s22 }
0x1018   :  { %v803_v7 = vpop.permute.xlu0 %802 }
0x1019   :  { %v805_v8 = vmul.f32 %v1472_v61, %v803_v7  ;;  %v807_v7 = vsel %vm806_vm12, 1, %v1500_v15 }
0x101b   :  { %v813_v9 = vrot.slane %v805_v8, 2 }
0x101d   :  { %814 = vrot.lane.b32.xlu1 %v813_v9, %s1499_s4 }
0x108f   :  { %v1686_v11 = vpop.permute.xlu1 %814 }
0x1090   :  { %1340 = vmatmul.mubr.msk.f32.vlgmr.msra.gmra.mrb[6].mxu1 %vm131_vm2, %v1686_v11 }
0x1091   :  { %1361 = vmatprep.mubr.msk.f32.mxu1 %vm1496_vm1, %v1497_v4 }
0x1163   :  { %v890_v14 = vpop.f32.mrb[6].mxu1 }
0x1164   :  { %v895_v16 = vrot.slane %v890_v14, 4  ;;  %v1341_v17 = vpop.f32.mrb[7].mxu1 }
0x1166   :  { %v897_v18 = vadd.f32 %v895_v16, %v1603_v13  ;;  %v1041_v16 = vsel %vm1040_vm14, 1, %v1500_v15 }
0x1168   :  { %1475 = vtanh.f32 %v897_v18  ;;  %v1203_v20 = vmul.f32 -1.442695, %v897_v18  ;;  %v1062_v18 = vsel %vm1061_vm15, %v1059_v1, %v1060_v3 }
0x1169   :  { %vm1063_vm4 = vcmp.eq.s32.totalorder %v1701_v33, %v1062_v18 }
0x116a   :  { %1477 = vpow2.f32 %v1203_v20 }
0x1172   :  { %v1476_v19 = vpop.eup %1475 }
0x1173   :  { %910 = vrot.lane.b32.xlu0 %v1476_v19, %s1498_s22  ;;  %v926_v19 = vsel %vm925_vm3, 1, %v1500_v15 }
0x1174   :  { %v1478_v21 = vpop.eup %1477 }
0x1175   :  { %v901_v22 = vadd.f32 1.0, %v1478_v21  ;;  %v1074_v21 = vld [vmem:[%s1779_s5 + $0x10] sm:$0xff] }
0x1177   :  { %1479 = vrcp.f32 %v901_v22 }
0x1181   :  { %v1480_v23 = vpop.eup %1479 }
0x1182   :  { %v908_v27 = vmul.f32 %v1480_v23, %v906_v26 }
0x11e5   :  { %v911_v24 = vpop.permute.xlu0 %910 }
0x11e6   :  { %v913_v25 = vmul.f32 %v1480_v23, %v911_v24 }
0x11e8   :  { %915 = vrot.lane.b32.xlu1 %v913_v25, %s1499_s4 }
0x125a   :  { %v916_v28 = vpop.permute.xlu1 %915 }
0x125b   :  { %v918_v29 = vadd.f32 %v916_v28, %v908_v27 }
0x125d   :  { %1481 = vtanh.f32 %v918_v29  ;;  %v1021_v58 = vrot.slane %v918_v29, 6 }
0x1267   :  { %v1482_v30 = vpop.eup %1481 }
0x1268   :  { %921 = vrot.lane.b32.xlu0 %v1482_v30, %s1498_s22 }
0x12da   :  { %v922_v32 = vpop.permute.xlu0 %921 }
0x12db   :  { %v924_v35 = vmul.f32 %v1480_v23, %v922_v32 }
0x12dd   :  { %v932_v36 = vrot.slane %v924_v35, 4 }
0x12df   :  { %933 = vrot.lane.b32.xlu1 %v932_v36, %s1499_s4 }
0x12e3   :  { %233 = vperm.xlu1 %1425, %v231_v37  }
0x12e7   :  { %346 = vperm.xlu1 %1425, %v344_v38  }
0x12eb   :  { %580 = vperm.xlu1 %1425, %v578_v39   ;;  %v1207_v39 = vld [vmem:[%s1781_s6] ss:$0 sm:$0xff] }
0x1351   :  { %v1710_v40 = vpop.permute.xlu1 %933 }
0x1352   :  { %1351 = vmatmul.mubr.msk.f32.vlgmr.msra.gmra.mrb[8].mxu0 %vm131_vm2, %v1710_v40 }
0x1362   :  { %v234_v41 = vpop.permute.xlu1 %233 }
0x1363   :  { %vm235_vm6 = vcmp.eq.s32.totalorder %v234_v41, 1 }
0x1364   :  { %v236_v42 = vsel %vm235_vm6, %v1611_v31, 0.0 }
0x1365   :  { %355 = vrot.lane.b32.xlu1 %v236_v42, %s1499_s4 }
0x1366   :  { %v347_v62 = vpop.permute.xlu1 %346 }
0x1367   :  { %vm348_vm13 = vcmp.eq.s32.totalorder %v347_v62, 1 }
0x136a   :  { %v581_v10 = vpop.permute.xlu1 %580 }
0x136b   :  { %vm582_vm1 = vcmp.eq.s32.totalorder %v581_v10, 1 }
0x13d7   :  { %v356_v6 = vpop.permute.xlu1 %355 }
0x13d8   :  { %v358_v9 = vsel %vm348_vm13, %v1627_v52, %v356_v6  ;;  %v1206_v52 = vsel %vm1063_vm4, 1.0, %v1497_v4  ;;  %v1075_v4 = vld [vmem:[%s1779_s5 + $0x18] sm:$0xff] }
0x13d9   :  { %v1416_v22 = vpack.c.bf16 %v1075_v4, %v1074_v21 }
0x1425   :  { %v1005_v43 = vpop.f32.mrb[8].mxu0 }
0x1426   :  { %v1010_v44 = vrot.slane %v1005_v43, 2  ;;  %v1352_v45 = vpop.f32.mrb[9].mxu0 }
0x1428   :  { %v1012_v46 = vadd.f32 %v1010_v44, %v1603_v13  ;;  %v463_v13 = vsel %vm462_vm7, 1, %v1500_v15 }
0x142a   :  { %1483 = vtanh.f32 %v1012_v46  ;;  %v1205_v48 = vmul.f32 -1.442695, %v1012_v46 }
0x142c   :  { %1485 = vpow2.f32 %v1205_v48 }
0x1434   :  { %v1484_v47 = vpop.eup %1483 }
0x1435   :  { %1025 = vrot.lane.b32.xlu0 %v1484_v47, %s1498_s22 }
0x1436   :  { %v1486_v49 = vpop.eup %1485 }
0x1437   :  { %v1016_v50 = vadd.f32 1.0, %v1486_v49 }
0x1439   :  { %1487 = vrcp.f32 %v1016_v50 }
0x1443   :  { %v1718_v53 = vpop.eup %1487 }
0x1444   :  { %v1023_v59 = vmul.f32 %v1718_v53, %v1021_v58 }
0x14a7   :  { %v1026_v54 = vpop.permute.xlu0 %1025 }
0x14a8   :  { %v1028_v31 = vmul.f32 %v1718_v53, %v1026_v54 }
0x14aa   :  { %1030 = vrot.lane.b32.xlu0 %v1028_v31, %s1499_s4 }
0x14ae   :  { %465 = vperm.xlu0 %1426, %v463_v13  }
0x14b2   :  { %692 = vperm.xlu0 %1426, %v690_v55  }
0x151c   :  { %v1031_v60 = vpop.permute.xlu0 %1030 }
0x151d   :  { %v1033_v61 = vadd.f32 %v1031_v60, %v1023_v59 }
0x151f   :  { %1489 = vtanh.f32 %v1033_v61 }
0x1529   :  { %v1490_v2 = vpop.eup %1489 }
0x152a   :  { %1036 = vrot.lane.b32.xlu1 %v1490_v2, %s1498_s22 }
0x152d   :  { %v466_v8 = vpop.permute.xlu0 %465 }
0x152e   :  { %vm467_vm0 = vcmp.eq.s32.totalorder %v466_v8, 1  ;;  %809 = vperm.xlu1 %1425, %v807_v7  }
0x152f   :  { %v473_v14 = vsel %vm467_vm0, %v1642_v12, %v358_v9  ;;  %v1072_v12 = vld [vmem:[%s1779_s5] sm:$0xff] }
0x1530   :  { %v588_v17 = vsel %vm582_vm1, %v1657_v34, %v473_v14  ;;  %v1073_v34 = vld [vmem:[%s1779_s5 + $0x8] sm:$0xff] }
0x1531   :  { %696 = vrot.lane.b32.xlu0 %v588_v17, %s1501_s1  ;;  %v1413_v20 = vpack.c.bf16 %v1073_v34, %v1072_v12  ;;  %v693_v25 = vpop.permute.xlu0 %692 }
0x1532   :  { %1043 = vperm.xlu1 %1425, %v1041_v16   ;;  %vm694_vm5 = vcmp.eq.s32.totalorder %v693_v25, 1 }
0x1533   :  { %1414 = vmatpush3.bf16.msra.mxu1 %v1413_v20 }
0x1534   :  { %1415 = vmatprep.subr.bf16.mxu1 %v1495_v0 }
0x1535   :  { %928 = vperm.xlu0 %1426, %v926_v19  }
0x1537   :  { %1417 = vmatpush3.bf16.msra.mxu1 %v1416_v22 }
0x1539   :  { %1068 = vperm.xlu0 %1426, %v1206_v52  }
0x159c   :  { %v1037_v23 = vpop.permute.xlu1 %1036 }
0x159d   :  { %v1039_v24 = vmul.f32 %v1718_v53, %v1037_v23 }
0x159f   :  { %v1047_v26 = vrot.slane %v1039_v24, 6 }
0x15a1   :  { %1048 = vrot.lane.b32.xlu0 %v1047_v26, %s1499_s4 }
0x15a3   :  { %v697_v27 = vpop.permute.xlu0 %696 }
0x15a4   :  { %v699_v0 = vsel %vm694_vm5, %v1671_v51, %v697_v27  ;;  %v14_v51 = vstv %s1780_s8 }
0x15a5   :  { %818 = vrot.lane.b32.xlu1 %v699_v0, %s1499_s4  ;;  %15 = vst [vmem:[#allocation2] sm:$0x1] %v14_v51 }
0x15ac   :  { %v1210_v46 = vld [vmem:[#allocation2] ss:$0 sm:$0xff] }
0x15ad   :  { %v810_v28 = vpop.permute.xlu1 %809 }
0x15ae   :  { %vm811_vm6 = vcmp.eq.s32.totalorder %v810_v28, 1 }
0x15b1   :  { %v1044_v15 = vpop.permute.xlu1 %1043 }
0x15b2   :  { %vm1045_vm8 = vcmp.eq.s32.totalorder %v1044_v15, 1 }
0x15b4   :  { %v929_v29 = vpop.permute.xlu0 %928 }
0x15b5   :  { %vm930_vm7 = vcmp.eq.s32.totalorder %v929_v29, 1 }
0x15b8   :  { %v1069_v30 = vpop.permute.xlu0 %1068 }
0x1613   :  { %v1049_v35 = vpop.permute.xlu0 %1048 }
0x1617   :  { %v819_v32 = vpop.permute.xlu1 %818 }
0x1618   :  { %v821_v33 = vsel %vm811_vm6, %v1686_v11, %v819_v32 }
0x1619   :  { %v936_v36 = vsel %vm930_vm7, %v1710_v40, %v821_v33  ;;  %v1209_v40 = vld [vmem:[%s1782_s7] ss:$0 sm:$0xff] }
0x161a   :  { %v1051_v37 = vsel %vm1045_vm8, %v1049_v35, %v936_v36 }
0x161b   :  { %v1071_v38 = vmul.f32 %v1069_v30, %v1051_v37 }
0x161d   :  { %1362 = vmatmul.mubr.msk.f32.vlgmr.msra.gmra.mrb[8].mxu1 %vm131_vm2, %v1071_v38 }
0x16f0   :  { %v1152_v41 = vpop.f32.mrb[8].mxu1 }
0x16f1   :  { %v1153_v42 = vadd.f32 %v1207_v39, %v1152_v41  ;;  %v1363_v11 = vpop.f32.mrb[9].mxu1 }
0x16f3   :  { %v1156_v43 = vmax.f32 %v1153_v42, 0.0 }
0x16f5   :  { %v1164_v44 = vmul.f32 %v1209_v40, %v1156_v43 }
0x16f7   :  { %v1166_v45 = vsel %vm1165_vm10, %v1164_v44, 0.0 }
0x16f8   :  { %1167 = vadd.xlane.f32.xlu1 %v1166_v45 }
0x1785   :  { %v1168_v47 = vpop.xlane.xlu1 %1167 }
0x1786   :  { %v1176_v48 = vadd.f32 %v1210_v46, %v1168_v47 }
0x1788   :  { %v1211_v49 = vmul.f32 -1.442695, %v1176_v48 }
0x178a   :  { %1491 = vpow2.f32 %v1211_v49 }
0x1794   :  { %v1492_v50 = vpop.eup %1491 }
0x1795   :  { %v1180_v53 = vadd.f32 1.0, %v1492_v50 }
0x1797   :  { %1493 = vrcp.f32 %v1180_v53 }
0x17a1   :  { %v1494_v54 = vpop.eup %1493 }
0x17a2   :  { %1183 = vst.msk [vmem:[%s1783_s9] sm:$0x3] %vm1052_vm9, %v1494_v54 }

</bundles_post_ra>
